<compile_context>
chip_gen: v5e
topology: v5e:2x2
jax: 0.10.0
libtpu: 0.0.40
codegen_flags: <defaults>
</compile_context>

<pallas_src>
import functools

import jax
import jax.numpy as jnp
from jax.experimental import pallas as pl
from jax.experimental.pallas import tpu as pltpu


# ----------------------------------------------------------------------------
# Hardware introspection (trace-time; conservative fallback = v7x per-TC VMEM).
# ----------------------------------------------------------------------------
def _vmem_capacity_bytes() -> int:
    try:
        info = pltpu.get_tpu_info()
        cap = int(getattr(info, "vmem_capacity_bytes", 0))
        if cap > 0:
            return cap
    except Exception:
        pass
    return 64 * 1024 * 1024


def _target_block_bytes(vmem_cap: int) -> int:
    # 4 buffers live at once (double-buffered input + output). 8 MiB blocks on
    # 128 MiB-VMEM parts (v5e/v6e), 4 MiB on 64 MiB parts (v7x).
    return (8 << 20) if vmem_cap >= (128 << 20) else (4 << 20)


def _vmem_limit(vmem_cap: int, block_bytes: int) -> int:
    # Pipeline buffers + headroom for Mosaic internal scratch, never below
    # 32 MiB, never above the physical per-core capacity.
    need = 4 * block_bytes + (8 << 20)
    return int(min(max(need, 32 << 20), vmem_cap))


# ----------------------------------------------------------------------------
# Pallas kernels.
# ----------------------------------------------------------------------------
def _copy_kernel(x_ref, o_ref):
    # x_ref / o_ref are VMEM tiles of identical shape.
    o_ref[...] = x_ref[...]


def _alias_noop_kernel(x_ref, o_ref):
    # Input and output alias the same HBM buffer (input_output_aliases={0: 0});
    # the identity requires no data movement at all.
    del x_ref, o_ref


def _choose_lane(total: int, max_lane: int = 4096) -> int:
    """Widest multiple of 128 (<= max_lane) that divides `total`.

    Only called when total % 128 == 0, so a valid lane always exists.
    """
    cand = min(max_lane, (total // 128) * 128)
    while cand >= 128:
        if total % cand == 0:
            return cand
        cand -= 128
    return 128


def _passthrough_2d(x2d, rows, lane, itemsize, vmem_cap):
    """Lane-dense 2-D blocked copy (full-width vst, single parallel grid axis)."""
    block_bytes = _target_block_bytes(vmem_cap)
    sublane = max(8, 32 // itemsize)              # 8 f32 / 16 bf16 / 32 int8
    block_rows = max(1, block_bytes // (lane * itemsize))
    block_rows = max(sublane, (block_rows // sublane) * sublane)
    if block_rows >= rows:
        block_rows = rows                         # full extent is always legal

    grid = (pl.cdiv(rows, block_rows),)
    spec = pl.BlockSpec((block_rows, lane), lambda i: (i, 0))
    return pl.pallas_call(
        _copy_kernel,
        out_shape=jax.ShapeDtypeStruct((rows, lane), x2d.dtype),
        grid=grid,
        in_specs=[spec],
        out_specs=spec,
        compiler_params=pltpu.CompilerParams(
            dimension_semantics=("parallel",),
            vmem_limit_bytes=_vmem_limit(vmem_cap, block_rows * lane * itemsize),
        ),
        cost_estimate=pl.CostEstimate(
            flops=0, transcendentals=0,
            bytes_accessed=2 * rows * lane * itemsize),
    )(x2d)


def _passthrough_1d(flat, total, itemsize, vmem_cap):
    """1-D blocked copy for element counts that are not a multiple of 128.

    No pad / slice: blocks are a multiple of 8*128 elements and Pallas masks
    the single ragged last block (if any).
    """
    block_bytes = _target_block_bytes(vmem_cap)
    block_elems = max(1024, ((block_bytes // itemsize) // 1024) * 1024)
    if block_elems >= total:
        block_elems = total                       # single full-extent block

    grid = (pl.cdiv(total, block_elems),)
    spec = pl.BlockSpec((block_elems,), lambda i: (i,))
    return pl.pallas_call(
        _copy_kernel,
        out_shape=jax.ShapeDtypeStruct((total,), flat.dtype),
        grid=grid,
        in_specs=[spec],
        out_specs=spec,
        compiler_params=pltpu.CompilerParams(
            dimension_semantics=("parallel",),
            vmem_limit_bytes=_vmem_limit(vmem_cap, block_elems * itemsize),
        ),
        cost_estimate=pl.CostEstimate(
            flops=0, transcendentals=0, bytes_accessed=2 * total * itemsize),
    )(flat)


def _passthrough_aliased(x):
    """Zero-HBM-traffic identity: output aliases the input buffer.

    The caller must also donate `x` at its own jit boundary to avoid XLA's
    defensive input copy; the result is correct either way.
    """
    return pl.pallas_call(
        _alias_noop_kernel,
        out_shape=jax.ShapeDtypeStruct(x.shape, x.dtype),
        in_specs=[pl.BlockSpec(memory_space=pl.ANY)],
        out_specs=pl.BlockSpec(memory_space=pl.ANY),
        input_output_aliases={0: 0},
    )(x)


@functools.partial(jax.jit, static_argnames=("donate",))
def pallas_passthrough(x: jax.Array, *, donate: bool = False) -> jax.Array:
    """Identity copy of an arbitrary tensor through a Pallas TPU kernel."""
    orig_shape = x.shape
    total = int(x.size)
    if total == 0:
        return x

    if donate:
        return _passthrough_aliased(x)

    vmem_cap = _vmem_capacity_bytes()
    itemsize = jnp.dtype(x.dtype).itemsize

    if total % 128 == 0:
        # Lane-dense 2-D slab; reshape is free (contiguous) under jit.
        lane = _choose_lane(total)
        rows = total // lane
        y2d = _passthrough_2d(x.reshape(rows, lane), rows, lane, itemsize, vmem_cap)
        return y2d.reshape(orig_shape)

    # Element count not a multiple of 128: 1-D layout, ragged last block masked.
    y = _passthrough_1d(x.reshape(-1), total, itemsize, vmem_cap)
    return y.reshape(orig_shape)


# ----------------------------------------------------------------------------
# JAX mirror of the abstract SpeechModel base class.
# ----------------------------------------------------------------------------
class SpeechModel:
    def __init__(self, cfg):
        self._config = cfg
        # Base class declares no parameters (PyTorch __init__ registers none).
        self._params = {}

    def forward(self, _input, lengths):
        # Exactly mirrors the reference: abstract in the base class.
        raise NotImplementedError

    def loss(self, x, y, x_length=None, y_length=None):
        raise NotImplementedError

    def init_weights(self):
        pass

    @property
    def is_cuda(self) -> bool:
        # No parameters exist; on JAX/TPU this is always False.
        return False

    @property
    def config(self) -> dict:
        return self._config

    def get_filter_images(self):
        return []

    def state_dict(self):
        return dict(self._params)

    @staticmethod
    def serialize(model, optimizer=None, epoch=None, iteration=None,
                  loss_results=None, cer_results=None, wer_results=None,
                  meta=None):
        package = {'config': model.config, 'state_dict': model.state_dict()}
        if optimizer is not None:
            package['optim_dict'] = optimizer
        if epoch is not None:
            package['epoch'] = epoch + 1
        if iteration is not None:
            package['iteration'] = iteration
        if loss_results is not None:
            package['loss_results'] = loss_results
            package['cer_results'] = cer_results
            package['wer_results'] = wer_results
        if meta is not None:
            package['meta'] = meta
        return package

    # Concrete on-device data path (identity) exposed for the demo / subclasses.
    def passthrough(self, _input, lengths, donate: bool = False):
        return pallas_passthrough(_input, donate=donate), lengths


if __name__ == "__main__":
    key = jax.random.PRNGKey(0)
    kx, kodd = jax.random.split(key)

    # Small NCHW spectrogram-like input and per-example lengths.
    N, C, H, W = 2, 4, 16, 16
    x = jax.random.normal(kx, (N, C, H, W), dtype=jnp.float32)
    lengths = jnp.array([16, 12], dtype=jnp.int32)

    model = SpeechModel(cfg={"name": "speech_model_base"})

    # Contract check: base-class forward is abstract, exactly as in PyTorch.
    try:
        model.forward(x, lengths)
        raise AssertionError("forward() should have raised NotImplementedError")
    except NotImplementedError:
        pass

    # 1) Default copy path (lane-dense 2-D blocked kernel).
    y, out_lengths = model.passthrough(x, lengths)
    y = jax.block_until_ready(y)
    assert y.shape == x.shape and y.dtype == x.dtype
    assert jnp.allclose(y, x)
    assert jnp.array_equal(out_lengths, lengths)

    # 2) Opt-in donated / aliased path (zero-HBM-traffic identity).
    y_alias, _ = model.passthrough(x, lengths, donate=True)
    y_alias = jax.block_until_ready(y_alias)
    assert y_alias.shape == x.shape and y_alias.dtype == x.dtype
    assert jnp.allclose(y_alias, x)

    # 3) Element count not a multiple of 128 -> 1-D path, no pad/slice.
    x_odd = jax.random.normal(kodd, (2, 3, 5, 7), dtype=jnp.float32)  # 210 elems
    y_odd = jax.block_until_ready(pallas_passthrough(x_odd))
    assert y_odd.shape == x_odd.shape
    assert jnp.allclose(y_odd, x_odd)

    # serialize() contract check.
    pkg = SpeechModel.serialize(model, epoch=0, iteration=7)
    assert pkg["config"]["name"] == "speech_model_base"
    assert pkg["epoch"] == 1 and pkg["iteration"] == 7
    assert model.get_filter_images() == []

    print("KERNEL_OK")
</pallas_src>

<mosaic_0001>
module attributes {stable_mosaic.version = 11 : i64} {
  func.func @_copy_kernel(%arg0: i32, %arg1: memref<1x2048xf32, #tpu.memory_space<vmem>>, %arg2: memref<1x2048xf32, #tpu.memory_space<vmem>>) attributes {dimension_semantics = [#tpu.dimension_semantics<parallel>], iteration_bounds = array<i64: 1>, scalar_prefetch = 0 : i64, scratch_operands = 0 : i64, tpu.core_type = #tpu.core_type<tc>, window_params = [{transform_indices = @transform_0, window_bounds = array<i64: 1, 2048>}, {transform_indices = @transform_1, window_bounds = array<i64: 1, 2048>}]} {
    %c0 = arith.constant 0 : index
    %c0_0 = arith.constant 0 : index
    %0 = vector.load %arg1[%c0, %c0_0] : memref<1x2048xf32, #tpu.memory_space<vmem>>, vector<1x2048xf32>
    %c0_1 = arith.constant 0 : index
    %c0_2 = arith.constant 0 : index
    %1 = vector.load %arg2[%c0_1, %c0_2] : memref<1x2048xf32, #tpu.memory_space<vmem>>, vector<1x2048xf32>
    tpu.vector_store %arg2[%c0_1, %c0_2], %0 {strides = array<i32>} : memref<1x2048xf32, #tpu.memory_space<vmem>>, vector<1x2048xf32>,
    return
  }
  func.func @transform_0(%arg0: i32) -> (i32, i32) {
    %c0_i32 = arith.constant 0 : i32
    %c0_i32_0 = arith.constant 0 : i32
    return %arg0, %c0_i32 : i32, i32
  }
  func.func @transform_1(%arg0: i32) -> (i32, i32) {
    %c0_i32 = arith.constant 0 : i32
    %c0_i32_0 = arith.constant 0 : i32
    return %arg0, %c0_i32 : i32, i32
  }
}

</mosaic_0001>

<bundles_post_ra>
// kernel: pallas_passthrough.1
= control target key start
LH: loop header
LB: loop body
LE: loop exit
PB: predicated region body
PF: predicated region fallthrough
CT: control target
= control target key end

     0   :  { %s38_s0 = inlined_call_operand.vmem [shape: f32[1,2048], index: 0, kind: input, shape index: {}]   ;;  %s39_s1 = inlined_call_operand.vmem [shape: f32[1,2048], index: 1, kind: output, shape index: {}]  }
   0x1   :  { %v8_v0 = vld [vmem:[%s38_s0] sm:$0xff]  ;;  %v9_v1 = vld [vmem:[%s38_s0 + $0x8] sm:$0xff] }
   0x2   :  { %10 = vst [vmem:[%s39_s1] sm:$0xff] %v8_v0 }
   0x3   :  { %11 = vst [vmem:[%s39_s1 + $0x8] sm:$0xff] %v9_v1 }

</bundles_post_ra>
